<compile_context>
chip_gen: v5e
topology: v5e:2x2
jax: 0.10.0
libtpu: 0.0.40
codegen_flags: <defaults>
</compile_context>

<pallas_src>
import jax
import jax.numpy as jnp
from jax.experimental import pallas as pl
from jax.experimental.pallas import tpu as pltpu


C_IN, C_MID, C_OUT = 2, 2, 2
K = 2                                   # 2x2 conv kernels
H_IN, W_IN = 4, 4
H1, W1 = H_IN - K + 1, W_IN - K + 1     # 3, 3  (after conv1)
H2, W2 = H1 - K + 1, W1 - K + 1         # 2, 2  (after conv2)
BN_EPS = 1e-5

# Packed parameter layout (flat f32, lives in SMEM):
#   [0:16)   w1[oc,ic,kh,kw]                       flat: ((oc*C_IN+ic)*K+kh)*K+kw
#   [16:32)  w2_folded = w2[oc,ic,kh,kw]*gamma[ic] (same flat layout)
#   [32:34)  bias2[oc] = sum_{ic,kh,kw} w2[oc,ic,kh,kw]*beta[ic]
_W1_OFF = 0
_W2_OFF = _W1_OFF + C_MID * C_IN * K * K       # 16
_B2_OFF = _W2_OFF + C_OUT * C_MID * K * K      # 32
N_PARAMS = _B2_OFF + C_OUT                     # 34


def model_kernel(params_ref, x_ref, out_ref):
    x = x_ref[...]                      # (C_IN*H_IN, W_IN) f32, one vreg

    def w1(oc, ic, kh, kw):             # SMEM scalar reads (sld)
        return params_ref[_W1_OFF + ((oc * C_IN + ic) * K + kh) * K + kw]

    def w2f(oc, ic, kh, kw):
        return params_ref[_W2_OFF + ((oc * C_MID + ic) * K + kh) * K + kw]

    def bias2(oc):
        return params_ref[_B2_OFF + oc]

    # ---- Hoist the 8 unique shifted x windows (shared by both mid channels).
    xwin = {}
    for ic in range(C_IN):
        base = ic * H_IN
        for kh in range(K):
            for kw in range(K):
                xwin[(ic, kh, kw)] = x[base + kh:base + kh + H1, kw:kw + W1]

    # ---- Conv1: compute BOTH mid-channel accumulators before any reduction.
    accs = []
    for mc in range(C_MID):
        acc = None
        for ic in range(C_IN):
            for kh in range(K):
                for kw in range(K):
                    term = w1(mc, ic, kh, kw) * xwin[(ic, kh, kw)]
                    acc = term if acc is None else acc + term
        accs.append(acc)

    # ---- BatchNorm normalization (training-mode batch stats, N=1, biased
    #      variance, eps=1e-5). Affine part pre-folded into conv2.
    #      All four reductions are independent, then both rsqrt's, so the
    #      XLU-reduce / EUP-rsqrt latencies overlap instead of serializing.
    inv_n = 1.0 / (H1 * W1)
    s1 = [jnp.sum(a) for a in accs]            # sum(x)
    s2 = [jnp.sum(a * a) for a in accs]        # sum(x^2)
    means = [s * inv_n for s in s1]
    varis = [q * inv_n - m * m for q, m in zip(s2, means)]   # E[x^2] - mean^2
    scales = [jax.lax.rsqrt(v + BN_EPS) for v in varis]
    t_hat = [(a - m) * sc for a, m, sc in zip(accs, means, scales)]

    # ---- Hoist the 8 unique t_hat windows (shared by both output channels).
    twin = {}
    for ic in range(C_MID):
        for kh in range(K):
            for kw in range(K):
                twin[(ic, kh, kw)] = t_hat[ic][kh:kh + H2, kw:kw + W2]

    # ---- Conv2 (gamma folded into weights, beta into bias) + Sigmoid.
    #      Store each channel directly into its (H2, W2) sub-block of the
    #      flat (C_OUT*H2, W2) output -- no concatenates / relayouts.
    for oc in range(C_OUT):
        acc = None
        for ic in range(C_MID):
            for kh in range(K):
                for kw in range(K):
                    term = w2f(oc, ic, kh, kw) * twin[(ic, kh, kw)]
                    acc = term if acc is None else acc + term
        out_ref[oc * H2:(oc + 1) * H2, :] = jax.nn.sigmoid(acc + bias2(oc))


def model_forward(x, w1, w2, gamma, beta):
    """x: (1, 2, 4, 4) NCHW float32 -> (1, 2, 2, 2) float32."""
    # Fold BN affine into conv2 (conv2 is linear in its input; VALID conv only).
    w2_fold = w2 * gamma[None, :, None, None]                  # (C_OUT,C_MID,K,K)
    bias2 = jnp.einsum("oikl,i->o", w2, beta)                  # (C_OUT,)
    params = jnp.concatenate(
        [w1.reshape(-1), w2_fold.reshape(-1), bias2]).astype(jnp.float32)
    assert params.shape == (N_PARAMS,)

    x2d = x.reshape(C_IN * H_IN, W_IN).astype(jnp.float32)     # (8, 4), N=1

    out = pl.pallas_call(
        model_kernel,
        out_shape=jax.ShapeDtypeStruct((C_OUT * H2, W2), jnp.float32),
        in_specs=[
            pl.BlockSpec(memory_space=pltpu.MemorySpace.SMEM),   # packed params
            pl.BlockSpec(memory_space=pltpu.MemorySpace.VMEM),   # x (8,4)
        ],
        out_specs=pl.BlockSpec(memory_space=pltpu.MemorySpace.VMEM),
        cost_estimate=pl.CostEstimate(
            flops=320, transcendentals=12, bytes_accessed=232),
    )(params, x2d)
    return out.reshape(1, C_OUT, H2, W2)


# ---------------- pure-JAX reference (original, unfolded weights) ------------
def _conv_ref(x, w, c_out, c_in, h_out, w_out):
    outs = []
    for oc in range(c_out):
        acc = jnp.zeros((h_out, w_out), jnp.float32)
        for ic in range(c_in):
            for kh in range(K):
                for kw in range(K):
                    acc = acc + w[oc, ic, kh, kw] * x[ic, kh:kh + h_out,
                                                      kw:kw + w_out]
        outs.append(acc)
    return jnp.stack(outs, axis=0)


def reference_forward(x, w1, w2, gamma, beta):
    xs = jnp.squeeze(x, 0)
    t = _conv_ref(xs, w1, C_MID, C_IN, H1, W1)
    mean = jnp.mean(t, axis=(1, 2), keepdims=True)
    var = jnp.mean((t - mean) ** 2, axis=(1, 2), keepdims=True)
    t = (t - mean) * jax.lax.rsqrt(var + BN_EPS)
    t = t * gamma[:, None, None] + beta[:, None, None]
    t2 = _conv_ref(t, w2, C_OUT, C_MID, H2, W2)
    return jax.nn.sigmoid(t2)[None, ...]


if __name__ == "__main__":
    key = jax.random.PRNGKey(0)
    kx, k1, k2, kg, kb = jax.random.split(key, 5)

    # Input matching the PyTorch script: torch.randn(1, 2, 4, 4)
    x = jax.random.normal(kx, (1, C_IN, H_IN, W_IN), dtype=jnp.float32)

    fan_in = C_IN * K * K
    w1 = jax.random.normal(k1, (C_MID, C_IN, K, K), jnp.float32) / jnp.sqrt(fan_in)
    w2 = jax.random.normal(k2, (C_OUT, C_MID, K, K), jnp.float32) / jnp.sqrt(fan_in)

    # 1) default BatchNorm2d init (gamma=1, beta=0) -- matches the spec module.
    gamma = jnp.ones((C_MID,), jnp.float32)
    beta = jnp.zeros((C_MID,), jnp.float32)
    out = jax.block_until_ready(model_forward(x, w1, w2, gamma, beta))
    ref = reference_forward(x, w1, w2, gamma, beta)
    assert out.shape == (1, C_OUT, H2, W2), out.shape
    assert jnp.allclose(out, ref, atol=1e-5, rtol=1e-5), (out, ref)

    # 2) non-trivial gamma/beta to validate the affine-folding path.
    gamma2 = 1.0 + 0.5 * jax.random.normal(kg, (C_MID,), jnp.float32)
    beta2 = 0.3 * jax.random.normal(kb, (C_MID,), jnp.float32)
    out2 = jax.block_until_ready(model_forward(x, w1, w2, gamma2, beta2))
    ref2 = reference_forward(x, w1, w2, gamma2, beta2)
    assert jnp.allclose(out2, ref2, atol=1e-5, rtol=1e-5), (out2, ref2)

    # TODO(synk): BN uses training-mode batch statistics (matches nn.BatchNorm2d
    # default train() behavior); eval()-mode running stats would need a different
    # (fully foldable) path.
    print("KERNEL_OK")
</pallas_src>

<mosaic_0001>
module attributes {stable_mosaic.version = 11 : i64} {
  func.func @model_kernel(%arg0: memref<34xf32, #tpu.memory_space<smem>>, %arg1: memref<8x4xf32, #tpu.memory_space<vmem>>, %arg2: memref<4x2xf32, #tpu.memory_space<vmem>>) attributes {dimension_semantics = [], scalar_prefetch = 0 : i64, scratch_operands = 0 : i64, tpu.core_type = #tpu.core_type<tc>} {
    %c0 = arith.constant 0 : index
    %c0_0 = arith.constant 0 : index
    %0 = vector.load %arg1[%c0, %c0_0] : memref<8x4xf32, #tpu.memory_space<vmem>>, vector<8x4xf32>
    %1 = vector.extract_strided_slice %0 {offsets = [0, 0], sizes = [3, 3], strides = [1, 1]} : vector<8x4xf32> to vector<3x3xf32>
    %2 = vector.extract_strided_slice %0 {offsets = [0, 1], sizes = [3, 3], strides = [1, 1]} : vector<8x4xf32> to vector<3x3xf32>
    %3 = vector.extract_strided_slice %0 {offsets = [1, 0], sizes = [3, 3], strides = [1, 1]} : vector<8x4xf32> to vector<3x3xf32>
    %4 = vector.extract_strided_slice %0 {offsets = [1, 1], sizes = [3, 3], strides = [1, 1]} : vector<8x4xf32> to vector<3x3xf32>
    %5 = vector.extract_strided_slice %0 {offsets = [4, 0], sizes = [3, 3], strides = [1, 1]} : vector<8x4xf32> to vector<3x3xf32>
    %6 = vector.extract_strided_slice %0 {offsets = [4, 1], sizes = [3, 3], strides = [1, 1]} : vector<8x4xf32> to vector<3x3xf32>
    %7 = vector.extract_strided_slice %0 {offsets = [5, 0], sizes = [3, 3], strides = [1, 1]} : vector<8x4xf32> to vector<3x3xf32>
    %8 = vector.extract_strided_slice %0 {offsets = [5, 1], sizes = [3, 3], strides = [1, 1]} : vector<8x4xf32> to vector<3x3xf32>
    %c0_1 = arith.constant 0 : index
    %9 = memref.load %arg0[%c0_1] : memref<34xf32, #tpu.memory_space<smem>>
    %10 = vector.broadcast %9 : f32 to vector<3x3xf32>
    %11 = arith.mulf %10, %1 : vector<3x3xf32>
    %c1 = arith.constant 1 : index
    %12 = memref.load %arg0[%c1] : memref<34xf32, #tpu.memory_space<smem>>
    %13 = vector.broadcast %12 : f32 to vector<3x3xf32>
    %14 = arith.mulf %13, %2 : vector<3x3xf32>
    %15 = arith.addf %11, %14 : vector<3x3xf32>
    %c2 = arith.constant 2 : index
    %16 = memref.load %arg0[%c2] : memref<34xf32, #tpu.memory_space<smem>>
    %17 = vector.broadcast %16 : f32 to vector<3x3xf32>
    %18 = arith.mulf %17, %3 : vector<3x3xf32>
    %19 = arith.addf %15, %18 : vector<3x3xf32>
    %c3 = arith.constant 3 : index
    %20 = memref.load %arg0[%c3] : memref<34xf32, #tpu.memory_space<smem>>
    %21 = vector.broadcast %20 : f32 to vector<3x3xf32>
    %22 = arith.mulf %21, %4 : vector<3x3xf32>
    %23 = arith.addf %19, %22 : vector<3x3xf32>
    %c4 = arith.constant 4 : index
    %24 = memref.load %arg0[%c4] : memref<34xf32, #tpu.memory_space<smem>>
    %25 = vector.broadcast %24 : f32 to vector<3x3xf32>
    %26 = arith.mulf %25, %5 : vector<3x3xf32>
    %27 = arith.addf %23, %26 : vector<3x3xf32>
    %c5 = arith.constant 5 : index
    %28 = memref.load %arg0[%c5] : memref<34xf32, #tpu.memory_space<smem>>
    %29 = vector.broadcast %28 : f32 to vector<3x3xf32>
    %30 = arith.mulf %29, %6 : vector<3x3xf32>
    %31 = arith.addf %27, %30 : vector<3x3xf32>
    %c6 = arith.constant 6 : index
    %32 = memref.load %arg0[%c6] : memref<34xf32, #tpu.memory_space<smem>>
    %33 = vector.broadcast %32 : f32 to vector<3x3xf32>
    %34 = arith.mulf %33, %7 : vector<3x3xf32>
    %35 = arith.addf %31, %34 : vector<3x3xf32>
    %c7 = arith.constant 7 : index
    %36 = memref.load %arg0[%c7] : memref<34xf32, #tpu.memory_space<smem>>
    %37 = vector.broadcast %36 : f32 to vector<3x3xf32>
    %38 = arith.mulf %37, %8 : vector<3x3xf32>
    %39 = arith.addf %35, %38 : vector<3x3xf32>
    %c8 = arith.constant 8 : index
    %40 = memref.load %arg0[%c8] : memref<34xf32, #tpu.memory_space<smem>>
    %41 = vector.broadcast %40 : f32 to vector<3x3xf32>
    %42 = arith.mulf %41, %1 : vector<3x3xf32>
    %c9 = arith.constant 9 : index
    %43 = memref.load %arg0[%c9] : memref<34xf32, #tpu.memory_space<smem>>
    %44 = vector.broadcast %43 : f32 to vector<3x3xf32>
    %45 = arith.mulf %44, %2 : vector<3x3xf32>
    %46 = arith.addf %42, %45 : vector<3x3xf32>
    %c10 = arith.constant 10 : index
    %47 = memref.load %arg0[%c10] : memref<34xf32, #tpu.memory_space<smem>>
    %48 = vector.broadcast %47 : f32 to vector<3x3xf32>
    %49 = arith.mulf %48, %3 : vector<3x3xf32>
    %50 = arith.addf %46, %49 : vector<3x3xf32>
    %c11 = arith.constant 11 : index
    %51 = memref.load %arg0[%c11] : memref<34xf32, #tpu.memory_space<smem>>
    %52 = vector.broadcast %51 : f32 to vector<3x3xf32>
    %53 = arith.mulf %52, %4 : vector<3x3xf32>
    %54 = arith.addf %50, %53 : vector<3x3xf32>
    %c12 = arith.constant 12 : index
    %55 = memref.load %arg0[%c12] : memref<34xf32, #tpu.memory_space<smem>>
    %56 = vector.broadcast %55 : f32 to vector<3x3xf32>
    %57 = arith.mulf %56, %5 : vector<3x3xf32>
    %58 = arith.addf %54, %57 : vector<3x3xf32>
    %c13 = arith.constant 13 : index
    %59 = memref.load %arg0[%c13] : memref<34xf32, #tpu.memory_space<smem>>
    %60 = vector.broadcast %59 : f32 to vector<3x3xf32>
    %61 = arith.mulf %60, %6 : vector<3x3xf32>
    %62 = arith.addf %58, %61 : vector<3x3xf32>
    %c14 = arith.constant 14 : index
    %63 = memref.load %arg0[%c14] : memref<34xf32, #tpu.memory_space<smem>>
    %64 = vector.broadcast %63 : f32 to vector<3x3xf32>
    %65 = arith.mulf %64, %7 : vector<3x3xf32>
    %66 = arith.addf %62, %65 : vector<3x3xf32>
    %c15 = arith.constant 15 : index
    %67 = memref.load %arg0[%c15] : memref<34xf32, #tpu.memory_space<smem>>
    %68 = vector.broadcast %67 : f32 to vector<3x3xf32>
    %69 = arith.mulf %68, %8 : vector<3x3xf32>
    %70 = arith.addf %66, %69 : vector<3x3xf32>
    %71 = vector.shape_cast %39 : vector<3x3xf32> to vector<1x3x3xf32>
    %cst = arith.constant dense<0.000000e+00> : vector<1xf32>
    %72 = vector.multi_reduction <add>, %71, %cst [1, 2] : vector<1x3x3xf32> to vector<1xf32>
    %73 = vector.shape_cast %72 : vector<1xf32> to vector<1x1x1xf32>
    %74 = vector.extract %73[0, 0, 0] : f32 from vector<1x1x1xf32>
    %75 = vector.shape_cast %70 : vector<3x3xf32> to vector<1x3x3xf32>
    %cst_2 = arith.constant dense<0.000000e+00> : vector<1xf32>
    %76 = vector.multi_reduction <add>, %75, %cst_2 [1, 2] : vector<1x3x3xf32> to vector<1xf32>
    %77 = vector.shape_cast %76 : vector<1xf32> to vector<1x1x1xf32>
    %78 = vector.extract %77[0, 0, 0] : f32 from vector<1x1x1xf32>
    %79 = arith.mulf %39, %39 : vector<3x3xf32>
    %80 = vector.shape_cast %79 : vector<3x3xf32> to vector<1x3x3xf32>
    %cst_3 = arith.constant dense<0.000000e+00> : vector<1xf32>
    %81 = vector.multi_reduction <add>, %80, %cst_3 [1, 2] : vector<1x3x3xf32> to vector<1xf32>
    %82 = vector.shape_cast %81 : vector<1xf32> to vector<1x1x1xf32>
    %83 = vector.extract %82[0, 0, 0] : f32 from vector<1x1x1xf32>
    %84 = arith.mulf %70, %70 : vector<3x3xf32>
    %85 = vector.shape_cast %84 : vector<3x3xf32> to vector<1x3x3xf32>
    %cst_4 = arith.constant dense<0.000000e+00> : vector<1xf32>
    %86 = vector.multi_reduction <add>, %85, %cst_4 [1, 2] : vector<1x3x3xf32> to vector<1xf32>
    %87 = vector.shape_cast %86 : vector<1xf32> to vector<1x1x1xf32>
    %88 = vector.extract %87[0, 0, 0] : f32 from vector<1x1x1xf32>
    %cst_5 = arith.constant 0.111111112 : f32
    %89 = arith.mulf %74, %cst_5 : f32
    %cst_6 = arith.constant 0.111111112 : f32
    %90 = arith.mulf %78, %cst_6 : f32
    %cst_7 = arith.constant 0.111111112 : f32
    %91 = arith.mulf %83, %cst_7 : f32
    %92 = arith.mulf %89, %89 : f32
    %93 = arith.subf %91, %92 : f32
    %cst_8 = arith.constant 0.111111112 : f32
    %94 = arith.mulf %88, %cst_8 : f32
    %95 = arith.mulf %90, %90 : f32
    %96 = arith.subf %94, %95 : f32
    %cst_9 = arith.constant 9.99999974E-6 : f32
    %97 = arith.addf %93, %cst_9 : f32
    %98 = math.rsqrt %97 : f32
    %cst_10 = arith.constant 9.99999974E-6 : f32
    %99 = arith.addf %96, %cst_10 : f32
    %100 = math.rsqrt %99 : f32
    %101 = vector.broadcast %89 : f32 to vector<3x3xf32>
    %102 = arith.subf %39, %101 : vector<3x3xf32>
    %103 = vector.broadcast %98 : f32 to vector<3x3xf32>
    %104 = arith.mulf %102, %103 : vector<3x3xf32>
    %105 = vector.broadcast %90 : f32 to vector<3x3xf32>
    %106 = arith.subf %70, %105 : vector<3x3xf32>
    %107 = vector.broadcast %100 : f32 to vector<3x3xf32>
    %108 = arith.mulf %106, %107 : vector<3x3xf32>
    %109 = vector.extract_strided_slice %104 {offsets = [0, 0], sizes = [2, 2], strides = [1, 1]} : vector<3x3xf32> to vector<2x2xf32>
    %110 = vector.extract_strided_slice %104 {offsets = [0, 1], sizes = [2, 2], strides = [1, 1]} : vector<3x3xf32> to vector<2x2xf32>
    %111 = vector.extract_strided_slice %104 {offsets = [1, 0], sizes = [2, 2], strides = [1, 1]} : vector<3x3xf32> to vector<2x2xf32>
    %112 = vector.extract_strided_slice %104 {offsets = [1, 1], sizes = [2, 2], strides = [1, 1]} : vector<3x3xf32> to vector<2x2xf32>
    %113 = vector.extract_strided_slice %108 {offsets = [0, 0], sizes = [2, 2], strides = [1, 1]} : vector<3x3xf32> to vector<2x2xf32>
    %114 = vector.extract_strided_slice %108 {offsets = [0, 1], sizes = [2, 2], strides = [1, 1]} : vector<3x3xf32> to vector<2x2xf32>
    %115 = vector.extract_strided_slice %108 {offsets = [1, 0], sizes = [2, 2], strides = [1, 1]} : vector<3x3xf32> to vector<2x2xf32>
    %116 = vector.extract_strided_slice %108 {offsets = [1, 1], sizes = [2, 2], strides = [1, 1]} : vector<3x3xf32> to vector<2x2xf32>
    %c16 = arith.constant 16 : index
    %117 = memref.load %arg0[%c16] : memref<34xf32, #tpu.memory_space<smem>>
    %118 = vector.broadcast %117 : f32 to vector<2x2xf32>
    %119 = arith.mulf %118, %109 : vector<2x2xf32>
    %c17 = arith.constant 17 : index
    %120 = memref.load %arg0[%c17] : memref<34xf32, #tpu.memory_space<smem>>
    %121 = vector.broadcast %120 : f32 to vector<2x2xf32>
    %122 = arith.mulf %121, %110 : vector<2x2xf32>
    %123 = arith.addf %119, %122 : vector<2x2xf32>
    %c18 = arith.constant 18 : index
    %124 = memref.load %arg0[%c18] : memref<34xf32, #tpu.memory_space<smem>>
    %125 = vector.broadcast %124 : f32 to vector<2x2xf32>
    %126 = arith.mulf %125, %111 : vector<2x2xf32>
    %127 = arith.addf %123, %126 : vector<2x2xf32>
    %c19 = arith.constant 19 : index
    %128 = memref.load %arg0[%c19] : memref<34xf32, #tpu.memory_space<smem>>
    %129 = vector.broadcast %128 : f32 to vector<2x2xf32>
    %130 = arith.mulf %129, %112 : vector<2x2xf32>
    %131 = arith.addf %127, %130 : vector<2x2xf32>
    %c20 = arith.constant 20 : index
    %132 = memref.load %arg0[%c20] : memref<34xf32, #tpu.memory_space<smem>>
    %133 = vector.broadcast %132 : f32 to vector<2x2xf32>
    %134 = arith.mulf %133, %113 : vector<2x2xf32>
    %135 = arith.addf %131, %134 : vector<2x2xf32>
    %c21 = arith.constant 21 : index
    %136 = memref.load %arg0[%c21] : memref<34xf32, #tpu.memory_space<smem>>
    %137 = vector.broadcast %136 : f32 to vector<2x2xf32>
    %138 = arith.mulf %137, %114 : vector<2x2xf32>
    %139 = arith.addf %135, %138 : vector<2x2xf32>
    %c22 = arith.constant 22 : index
    %140 = memref.load %arg0[%c22] : memref<34xf32, #tpu.memory_space<smem>>
    %141 = vector.broadcast %140 : f32 to vector<2x2xf32>
    %142 = arith.mulf %141, %115 : vector<2x2xf32>
    %143 = arith.addf %139, %142 : vector<2x2xf32>
    %c23 = arith.constant 23 : index
    %144 = memref.load %arg0[%c23] : memref<34xf32, #tpu.memory_space<smem>>
    %145 = vector.broadcast %144 : f32 to vector<2x2xf32>
    %146 = arith.mulf %145, %116 : vector<2x2xf32>
    %147 = arith.addf %143, %146 : vector<2x2xf32>
    %c32 = arith.constant 32 : index
    %148 = memref.load %arg0[%c32] : memref<34xf32, #tpu.memory_space<smem>>
    %149 = vector.broadcast %148 : f32 to vector<2x2xf32>
    %150 = arith.addf %147, %149 : vector<2x2xf32>
    %151 = arith.negf %150 : vector<2x2xf32>
    %152 = math.exp %151 : vector<2x2xf32>
    %cst_11 = arith.constant 1.000000e+00 : f32
    %153 = vector.broadcast %cst_11 : f32 to vector<2x2xf32>
    %154 = arith.addf %153, %152 : vector<2x2xf32>
    %155 = arith.divf %153, %154 : vector<2x2xf32>
    %c0_12 = arith.constant 0 : index
    %c0_13 = arith.constant 0 : index
    %156 = vector.load %arg2[%c0_12, %c0_13] : memref<4x2xf32, #tpu.memory_space<vmem>>, vector<2x2xf32>
    tpu.vector_store %arg2[%c0_12, %c0_13], %155 {strides = array<i32>} : memref<4x2xf32, #tpu.memory_space<vmem>>, vector<2x2xf32>,
    %c24 = arith.constant 24 : index
    %157 = memref.load %arg0[%c24] : memref<34xf32, #tpu.memory_space<smem>>
    %158 = vector.broadcast %157 : f32 to vector<2x2xf32>
    %159 = arith.mulf %158, %109 : vector<2x2xf32>
    %c25 = arith.constant 25 : index
    %160 = memref.load %arg0[%c25] : memref<34xf32, #tpu.memory_space<smem>>
    %161 = vector.broadcast %160 : f32 to vector<2x2xf32>
    %162 = arith.mulf %161, %110 : vector<2x2xf32>
    %163 = arith.addf %159, %162 : vector<2x2xf32>
    %c26 = arith.constant 26 : index
    %164 = memref.load %arg0[%c26] : memref<34xf32, #tpu.memory_space<smem>>
    %165 = vector.broadcast %164 : f32 to vector<2x2xf32>
    %166 = arith.mulf %165, %111 : vector<2x2xf32>
    %167 = arith.addf %163, %166 : vector<2x2xf32>
    %c27 = arith.constant 27 : index
    %168 = memref.load %arg0[%c27] : memref<34xf32, #tpu.memory_space<smem>>
    %169 = vector.broadcast %168 : f32 to vector<2x2xf32>
    %170 = arith.mulf %169, %112 : vector<2x2xf32>
    %171 = arith.addf %167, %170 : vector<2x2xf32>
    %c28 = arith.constant 28 : index
    %172 = memref.load %arg0[%c28] : memref<34xf32, #tpu.memory_space<smem>>
    %173 = vector.broadcast %172 : f32 to vector<2x2xf32>
    %174 = arith.mulf %173, %113 : vector<2x2xf32>
    %175 = arith.addf %171, %174 : vector<2x2xf32>
    %c29 = arith.constant 29 : index
    %176 = memref.load %arg0[%c29] : memref<34xf32, #tpu.memory_space<smem>>
    %177 = vector.broadcast %176 : f32 to vector<2x2xf32>
    %178 = arith.mulf %177, %114 : vector<2x2xf32>
    %179 = arith.addf %175, %178 : vector<2x2xf32>
    %c30 = arith.constant 30 : index
    %180 = memref.load %arg0[%c30] : memref<34xf32, #tpu.memory_space<smem>>
    %181 = vector.broadcast %180 : f32 to vector<2x2xf32>
    %182 = arith.mulf %181, %115 : vector<2x2xf32>
    %183 = arith.addf %179, %182 : vector<2x2xf32>
    %c31 = arith.constant 31 : index
    %184 = memref.load %arg0[%c31] : memref<34xf32, #tpu.memory_space<smem>>
    %185 = vector.broadcast %184 : f32 to vector<2x2xf32>
    %186 = arith.mulf %185, %116 : vector<2x2xf32>
    %187 = arith.addf %183, %186 : vector<2x2xf32>
    %c33 = arith.constant 33 : index
    %188 = memref.load %arg0[%c33] : memref<34xf32, #tpu.memory_space<smem>>
    %189 = vector.broadcast %188 : f32 to vector<2x2xf32>
    %190 = arith.addf %187, %189 : vector<2x2xf32>
    %191 = arith.negf %190 : vector<2x2xf32>
    %192 = math.exp %191 : vector<2x2xf32>
    %cst_14 = arith.constant 1.000000e+00 : f32
    %193 = vector.broadcast %cst_14 : f32 to vector<2x2xf32>
    %194 = arith.addf %193, %192 : vector<2x2xf32>
    %195 = arith.divf %193, %194 : vector<2x2xf32>
    %c2_15 = arith.constant 2 : index
    %c0_16 = arith.constant 0 : index
    %196 = vector.load %arg2[%c2_15, %c0_16] : memref<4x2xf32, #tpu.memory_space<vmem>>, vector<2x2xf32>
    tpu.vector_store %arg2[%c2_15, %c0_16], %195 {strides = array<i32>} : memref<4x2xf32, #tpu.memory_space<vmem>>, vector<2x2xf32>,
    return
  }
}

</mosaic_0001>

<bundles_post_ra>
// kernel: tpu_custom_call.1
= control target key start
LH: loop header
LB: loop body
LE: loop exit
PB: predicated region body
PF: predicated region fallthrough
CT: control target
= control target key end

     0   :  { %7 = vsyncpa [#allocation3], 0  ;;  %s465_s12 = smov [#allocation2]   ;;  %s550_s0 = inlined_call_operand.vmem [shape: f32[34], index: 0, kind: input, shape index: {}]   ;;  %s551_s1 = inlined_call_operand.vmem [shape: f32[8,4], index: 1, kind: input, shape index: {}]   ;;  %s552_s2 = inlined_call_operand.vmem [shape: f32[4,2], index: 2, kind: output, shape index: {}]  }
   0x1   :  { %s13_s11 = sshll.u32 %s550_s0, 4  ;;  %s14_s11 = int_to_ptr.vmem [resolvable:$true] %s13_s11 }
   0x2   :  { %16 = dma.vmem_to_smem %s14_s11, 16, %s465_s12, [#allocation3]  }
   0x3   :  { %463 = dma.done.wait [#allocation3], 16  }
   0x4   :  { %464 = vsyncadd [#allocation3], 4294967280 }
   0x5   :  { %23 = sfence }
   0x6   :  { %s390_s13 = sld [smem:[#allocation2 + $0x1]]  ;;  %v488_v0 = vld [vmem:[%s551_s1] sm:$0xff]  ;;  %s466_s21 = smov 127   ;;  %vm143_vm0 = vcmask 18432   ;;  %vm305_vm11 = vcmask 9216  }
   0x7   :  { %s392_s14 = sld [smem:[#allocation2 + $0x3]] }
   0x8   :  { %s398_s15 = sld [smem:[#allocation2 + $0x9]] }
   0x9   :  { %s400_s16 = sld [smem:[#allocation2 + $0xb]] }
   0xa   :  { %s396_s19 = sld [smem:[#allocation2 + $0x7]] }
   0xb   :  { %s394_s20 = sld [smem:[#allocation2 + $0x5]] }
   0xc   :  { %v29_v1 = vstv %s390_s13  ;;  %s402_s0 = sld [smem:[#allocation2 + $0xd]] }
   0xd   :  { %v30_v2 = vmul.f32 %v29_v1, %v488_v0  ;;  %v44_v3 = vstv %s392_s14  ;;  %s404_s22 = sld [smem:[#allocation2 + $0xf]] }
   0xe   :  { %v45_v4 = vmul.f32 %v44_v3, %v488_v0  ;;  %v88_v7 = vstv %s398_s15  ;;  %s391_s1 = sld [smem:[#allocation2 + $0x2]] }
   0xf   :  { %32 = vrot.lane.b32.xlu0 %v30_v2, %s466_s21  ;;  %v103_v5 = vstv %s400_s16  ;;  %v89_v10 = vmul.f32 %v88_v7, %v488_v0  ;;  %s25_s23 = sld [smem:[#allocation2]] }
  0x10   :  { %v47_v6 = vrot.slane %v45_v4, 1  ;;  %v104_v8 = vmul.f32 %v103_v5, %v488_v0  ;;  %v76_v12 = vstv %s396_s19  ;;  %s393_s24 = sld [smem:[#allocation2 + $0x4]] }
  0x11   :  { %v60_v9 = vstv %s394_s20  ;;  %v77_v16 = vmul.f32 %v76_v12, %v488_v0  ;;  %s399_s25 = sld [smem:[#allocation2 + $0xa]] }
  0x12   :  { %48 = vrot.lane.b32.xlu1 %v47_v6, %s466_s21  ;;  %v61_v11 = vmul.f32 %v60_v9, %v488_v0  ;;  %v119_v13 = vstv %s402_s0  ;;  %v106_v15 = vrot.slane %v104_v8, 1  ;;  %s397_s26 = sld [smem:[#allocation2 + $0x8]] }
  0x13   :  { %v135_v17 = vstv %s404_s22  ;;  %v120_v18 = vmul.f32 %v119_v13, %v488_v0  ;;  %v79_v20 = vrot.slane %v77_v16, 5  ;;  %s395_s27 = sld [smem:[#allocation2 + $0x6]] }
  0x14   :  { %v63_v14 = vrot.slane %v61_v11, 4  ;;  %v136_v19 = vmul.f32 %v135_v17, %v488_v0  ;;  %v37_v23 = vstv %s391_s1  ;;  %s401_s28 = sld [smem:[#allocation2 + $0xc]] }
  0x15   :  { %v122_v21 = vrot.slane %v120_v18, 4  ;;  %v26_v24 = vstv %s25_s23  ;;  %v38_v25 = vmul.f32 %v37_v23, %v488_v0  ;;  %s403_s29 = sld [smem:[#allocation2 + $0xe]] }
  0x16   :  { %64 = vrot.lane.b32.xlu2 %v63_v14, %s466_s21  ;;  %v138_v22 = vrot.slane %v136_v19, 5  ;;  %v53_v26 = vstv %s393_s24  ;;  %v27_v27 = vmul.f32 %v26_v24, %v488_v0  ;;  %s416_s16 = sld [smem:[#allocation2 + $0x19]] }
  0x17   :  { %91 = vrot.lane.b32.xlu0 %v89_v10, %s466_s21  ;;  %v40_v28 = vrot.slane %v38_v25, 1  ;;  %v54_v29 = vmul.f32 %v53_v26, %v488_v0  ;;  %v96_v31 = vstv %s399_s25  ;;  %s406_s17 = sld [smem:[#allocation2 + $0x11]] }
  0x18   :  { %v85_v33 = vstv %s397_s26  ;;  %v97_v37 = vmul.f32 %v96_v31, %v488_v0  ;;  %s408_s18 = sld [smem:[#allocation2 + $0x13]] }
  0x19   :  { %v56_v36 = vrot.slane %v54_v29, 4  ;;  %v69_v38 = vstv %s395_s27  ;;  %v86_v42 = vmul.f32 %v85_v33, %v488_v0  ;;  %s418_s19 = sld [smem:[#allocation2 + $0x1b]] }
  0x1a   :  { %107 = vrot.lane.b32.xlu1 %v106_v15, %s466_s21  ;;  %v112_v40 = vstv %s401_s28  ;;  %v70_v43 = vmul.f32 %v69_v38, %v488_v0  ;;  %v99_v45 = vrot.slane %v97_v37, 1  ;;  %s410_s0 = sld [smem:[#allocation2 + $0x15]] }
  0x1b   :  { %v113_v46 = vmul.f32 %v112_v40, %v488_v0  ;;  %v128_v48 = vstv %s403_s29  ;;  %s420_s1 = sld [smem:[#allocation2 + $0x1d]] }
  0x1c   :  { %v72_v50 = vrot.slane %v70_v43, 5  ;;  %v129_v55 = vmul.f32 %v128_v48, %v488_v0  ;;  %s412_s23 = sld [smem:[#allocation2 + $0x17]] }
  0x1d   :  { %v115_v54 = vrot.slane %v113_v46, 4  ;;  %s422_s24 = sld [smem:[#allocation2 + $0x1f]] }
  0x1e   :  { %123 = vrot.lane.b32.xlu2 %v122_v21, %s466_s21  ;;  %v131_v60 = vrot.slane %v129_v55, 5  ;;  %s405_s25 = sld [smem:[#allocation2 + $0x10]] }
  0x1f   :  { %80 = vrot.lane.b32.xlu0 %v79_v20, %s466_s21  ;;  %s407_s26 = sld [smem:[#allocation2 + $0x12]] }
  0x20   :  { %s415_s27 = sld [smem:[#allocation2 + $0x18]] }
  0x21   :  { %s417_s28 = sld [smem:[#allocation2 + $0x1a]] }
  0x22   :  { %139 = vrot.lane.b32.xlu1 %v138_v22, %s466_s21  ;;  %s409_s29 = sld [smem:[#allocation2 + $0x14]] }
  0x70   :  { %v65_v39 = vpop.permute.xlu2 %64 }
  0x78   :  { %v124_v57 = vpop.permute.xlu2 %123 }
  0x81   :  { %v33_v30 = vpop.permute.xlu0 %32 }
  0x82   :  { %v35_v32 = vadd.f32 %v33_v30, %v27_v27 }
  0x84   :  { %v49_v34 = vpop.permute.xlu1 %48  ;;  %v42_v35 = vadd.f32 %v40_v28, %v35_v32 }
  0x86   :  { %v51_v41 = vadd.f32 %v49_v34, %v42_v35 }
  0x88   :  { %v58_v44 = vadd.f32 %v56_v36, %v51_v41 }
  0x89   :  { %v92_v47 = vpop.permute.xlu0 %91 }
  0x8a   :  { %v94_v49 = vadd.f32 %v92_v47, %v86_v42  ;;  %v67_v51 = vadd.f32 %v65_v39, %v58_v44 }
  0x8c   :  { %v108_v52 = vpop.permute.xlu1 %107  ;;  %v101_v53 = vadd.f32 %v99_v45, %v94_v49  ;;  %v74_v59 = vadd.f32 %v72_v50, %v67_v51 }
  0x8e   :  { %v110_v56 = vadd.f32 %v108_v52, %v101_v53 }
  0x90   :  { %v117_v58 = vadd.f32 %v115_v54, %v110_v56  ;;  %v311_v56 = vstv %s416_s16 }
  0x91   :  { %v81_v61 = vpop.permute.xlu0 %80 }
  0x92   :  { %v126_v62 = vadd.f32 %v124_v57, %v117_v58  ;;  %v514_v63 = vadd.f32 %v81_v61, %v74_v59  ;;  %v232_v57 = vstv %s406_s17  ;;  %v247_v58 = vstv %s408_s18 }
  0x94   :  { %v140_v1 = vpop.permute.xlu1 %139  ;;  %v133_v2 = vadd.f32 %v131_v60, %v126_v62  ;;  %v144_v3 = vsel %vm143_vm0, %v514_v63, 0.0  ;;  %v164_v4 = vmul.f32 %v514_v63, %v514_v63 }
  0x95   :  { %145 = vadd.xlane.f32.xlu2 %v144_v3  ;;  %v326_v3 = vstv %s418_s19 }
  0x96   :  { %v519_v5 = vadd.f32 %v140_v1, %v133_v2  ;;  %v165_v0 = vsel %vm143_vm0, %v164_v4, 0.0 }
  0x97   :  { %166 = vadd.xlane.f32.xlu1 %v165_v0 }
  0x98   :  { %v154_v6 = vsel %vm143_vm0, %v519_v5, 0.0  ;;  %v175_v7 = vmul.f32 %v519_v5, %v519_v5 }
  0x99   :  { %155 = vadd.xlane.f32.xlu0 %v154_v6 }
  0x9a   :  { %v176_v8 = vsel %vm143_vm0, %v175_v7, 0.0  ;;  %v260_v7 = vstv %s410_s0 }
  0x9d   :  { %177 = vadd.xlane.f32.xlu2 %v176_v8  ;;  %v339_v8 = vstv %s420_s1 }
 0x108   :  { %v146_v9 = vpop.xlane.xlu2 %145 }
 0x109   :  { %v147_v10 = vrot.slane %v146_v9, 4 }
 0x10a   :  { %v167_v11 = vpop.xlane.xlu1 %166 }
 0x10b   :  { %v148_v12 = vadd.f32 %v147_v10, %v146_v9  ;;  %v168_v13 = vrot.slane %v167_v11, 4 }
 0x10c   :  { %v156_v14 = vpop.xlane.xlu0 %155 }
 0x10d   :  { %v149_v15 = vrot.slane %v148_v12, 2  ;;  %v169_v16 = vadd.f32 %v168_v13, %v167_v11  ;;  %v157_v17 = vrot.slane %v156_v14, 4  ;;  %v275_v11 = vstv %s412_s23 }
 0x10f   :  { %v170_v18 = vrot.slane %v169_v16, 2  ;;  %v158_v19 = vadd.f32 %v157_v17, %v156_v14  ;;  %v150_v20 = vadd.f32 %v149_v15, %v148_v12  ;;  %v354_v12 = vstv %s422_s24 }
 0x110   :  { %v178_v21 = vpop.xlane.xlu2 %177  ;;  %v229_v17 = vstv %s405_s25 }
 0x111   :  { %v159_v22 = vrot.slane %v158_v19, 2  ;;  %v179_v23 = vrot.slane %v178_v21, 4  ;;  %v151_v24 = vrot.slane %v150_v20, 1  ;;  %v171_v25 = vadd.f32 %v170_v18, %v169_v16 }
 0x112   :  { %v240_v18 = vstv %s407_s26 }
 0x113   :  { %v180_v26 = vadd.f32 %v179_v23, %v178_v21  ;;  %v152_v27 = vadd.f32 %v151_v24, %v150_v20  ;;  %v160_v28 = vadd.f32 %v159_v22, %v158_v19  ;;  %v172_v29 = vrot.slane %v171_v25, 1 }
 0x114   :  { %v308_v23 = vstv %s415_s27  ;;  %v319_v24 = vstv %s417_s28 }
 0x115   :  { %v181_v30 = vrot.slane %v180_v26, 2  ;;  %425 = vpush %v152_v27  ;;  %v161_v31 = vrot.slane %v160_v28, 1  ;;  %v173_v34 = vadd.f32 %v172_v29, %v171_v25  ;;  %v256_v27 = vstv %s409_s29 }
 0x117   :  { %v162_v32 = vadd.f32 %v161_v31, %v160_v28  ;;  %v182_v33 = vadd.f32 %v181_v30, %v180_v26 }
 0x119   :  { %427 = vpush %v162_v32  ;;  %v183_v35 = vrot.slane %v182_v33, 1 }
 0x11a   :  { %429 = vpush %v173_v34 }
 0x11b   :  { %v184_v36 = vadd.f32 %v183_v35, %v182_v33 }
 0x11d   :  { %431 = vpush %v184_v36 }
 0x146   :  { %s426_s30 = spop %425 }
 0x147   :  { %s524_s3 = smul.f32 0.11111111, %s426_s30  ;;  %s411_s30 = sld [smem:[#allocation2 + $0x16]] }
 0x149   :  { %s189_s4 = smul.f32 %s524_s3, %s524_s3  ;;  %v220_v53 = vstv %s524_s3  ;;  %s419_s3 = sld [smem:[#allocation2 + $0x1c]] }
 0x14a   :  { %s428_s5 = spop %427  ;;  %v221_v54 = vsub.f32 %v514_v63, %v220_v53 }
 0x14b   :  { %s528_s6 = smul.f32 0.11111111, %s428_s5  ;;  %s430_s7 = spop %429 }
 0x14c   :  { %s188_s8 = smul.f32 0.11111111, %s430_s7  ;;  %s413_s5 = sld [smem:[#allocation2 + $0x20]] }
 0x14d   :  { %s192_s9 = smul.f32 %s528_s6, %s528_s6  ;;  %v224_v60 = vstv %s528_s6  ;;  %v268_v28 = vstv %s411_s30 }
 0x14e   :  { %s190_s10 = ssub.f32 %s188_s8, %s189_s4  ;;  %s432_s11 = spop %431  ;;  %v225_v4 = vsub.f32 %v519_v5, %v224_v60 }
 0x14f   :  { %s191_s12 = smul.f32 0.11111111, %s432_s11  ;;  %s421_s4 = sld [smem:[#allocation2 + $0x1e]] }
 0x150   :  { %s194_s13 = sadd.f32 1e-05, %s190_s10 }
 0x151   :  { %s193_s14 = ssub.f32 %s191_s12, %s192_s9 }
 0x152   :  { %v195_v37 = vstv %s194_s13 }
 0x153   :  { %439 = vrsqrt.f32 %v195_v37  ;;  %s207_s15 = sadd.f32 1e-05, %s193_s14  ;;  %vm202_vm2 = vweird.f32 %v195_v37 }
 0x155   :  { %v208_v38 = vstv %s207_s15 }
 0x156   :  { %441 = vrsqrt.f32 %v208_v38  ;;  %vm215_vm5 = vweird.f32 %v208_v38 }
 0x159   :  { %v440_v39 = vpop.eup %439 }
 0x15a   :  { %v197_v40 = vmul.f32 %v440_v39, %v195_v37  ;;  %vm203_vm1 = vweird.f32 %v440_v39 }
 0x15b   :  { %vm204_vm3 = vmor %vm202_vm2, %vm203_vm1 }
 0x15c   :  { %v442_v41 = vpop.eup %441  ;;  %v198_v42 = vmul.f32 %v440_v39, %v197_v40  ;;  %v335_v40 = vstv %s419_s3 }
 0x15d   :  { %v210_v43 = vmul.f32 %v442_v41, %v208_v38  ;;  %vm216_vm4 = vweird.f32 %v442_v41 }
 0x15e   :  { %v199_v44 = vmul.f32 0.5, %v198_v42  ;;  %vm217_vm6 = vmor %vm215_vm5, %vm216_vm4 }
 0x15f   :  { %v211_v45 = vmul.f32 %v442_v41, %v210_v43 }
 0x160   :  { %v200_v46 = vsub.f32 1.5, %v199_v44 }
 0x161   :  { %v212_v47 = vmul.f32 0.5, %v211_v45 }
 0x162   :  { %v201_v48 = vmul.f32 %v440_v39, %v200_v46 }
 0x163   :  { %v213_v49 = vsub.f32 1.5, %v212_v47 }
 0x164   :  { %v205_v50 = vsel %vm204_vm3, %v440_v39, %v201_v48 }
 0x165   :  { %433 = vpush %v205_v50  ;;  %v214_v51 = vmul.f32 %v442_v41, %v213_v49 }
 0x167   :  { %v218_v52 = vsel %vm217_vm6, %v442_v41, %v214_v51  ;;  %v347_v41 = vstv %s421_s4 }
 0x168   :  { %435 = vpush %v218_v52 }
 0x196   :  { %s434_s20 = spop %433 }
 0x197   :  { %v222_v55 = vstv %s434_s20 }
 0x198   :  { %v223_v59 = vmul.f32 %v222_v55, %v221_v54 }
 0x199   :  { %s436_s22 = spop %435 }
 0x19a   :  { %v312_v61 = vmul.f32 %v311_v56, %v223_v59  ;;  %v233_v62 = vmul.f32 %v232_v57, %v223_v59  ;;  %v248_v1 = vmul.f32 %v247_v58, %v223_v59  ;;  %v226_v2 = vstv %s436_s22 }
 0x19b   :  { %v227_v0 = vmul.f32 %v226_v2, %v225_v4  ;;  %v327_v6 = vmul.f32 %v326_v3, %v223_v59  ;;  %v230_v20 = vmul.f32 %v229_v17, %v223_v59  ;;  %v241_v21 = vmul.f32 %v240_v18, %v223_v59 }
 0x19c   :  { %314 = vrot.lane.b32.xlu0 %v312_v61, %s466_s21  ;;  %235 = vrot.lane.b32.xlu2 %v233_v62, %s466_s21  ;;  %v250_v63 = vrot.slane %v248_v1, 1  ;;  %v309_v29 = vmul.f32 %v308_v23, %v223_v59  ;;  %v320_v31 = vmul.f32 %v319_v24, %v223_v59  ;;  %v284_v57 = vstv %s413_s5 }
 0x19d   :  { %v329_v9 = vrot.slane %v327_v6, 1  ;;  %v261_v10 = vmul.f32 %v260_v7, %v227_v0  ;;  %v340_v5 = vmul.f32 %v339_v8, %v227_v0  ;;  %v276_v13 = vmul.f32 %v275_v11, %v227_v0 }
 0x19e   :  { %251 = vrot.lane.b32.xlu1 %v250_v63, %s466_s21  ;;  %v355_v14 = vmul.f32 %v354_v12, %v227_v0  ;;  %v243_v25 = vrot.slane %v241_v21, 1  ;;  %v257_v35 = vmul.f32 %v256_v27, %v227_v0  ;;  %v269_v36 = vmul.f32 %v268_v28, %v227_v0 }
 0x19f   :  { %v278_v15 = vrot.slane %v276_v13, 1  ;;  %v322_v38 = vrot.slane %v320_v31, 1  ;;  %v348_v47 = vmul.f32 %v347_v41, %v227_v0  ;;  %v336_v48 = vmul.f32 %v335_v40, %v227_v0 }
 0x1a0   :  { %v357_v16 = vrot.slane %v355_v14, 1  ;;  %v271_v44 = vrot.slane %v269_v36, 1 }
 0x1a1   :  { %v350_v52 = vrot.slane %v348_v47, 1 }
 0x1a4   :  { %330 = vrot.lane.b32.xlu0 %v329_v9, %s466_s21  ;;  %263 = vrot.lane.b32.xlu2 %v261_v10, %s466_s21 }
 0x1a6   :  { %342 = vrot.lane.b32.xlu1 %v340_v5, %s466_s21 }
 0x1ac   :  { %279 = vrot.lane.b32.xlu0 %v278_v15, %s466_s21  ;;  %358 = vrot.lane.b32.xlu2 %v357_v16, %s466_s21  ;;  %s423_s21 = sld [smem:[#allocation2 + $0x21]] }
 0x1b2   :  { %v363_v56 = vstv %s423_s21 }
 0x1f6   :  { %v236_v19 = vpop.permute.xlu2 %235 }
 0x1f7   :  { %v238_v22 = vadd.f32 %v236_v19, %v230_v20 }
 0x1f9   :  { %v245_v30 = vadd.f32 %v243_v25, %v238_v22 }
 0x1fe   :  { %v264_v39 = vpop.permute.xlu2 %263 }
 0x206   :  { %v359_v55 = vpop.permute.xlu2 %358 }
 0x20e   :  { %v315_v26 = vpop.permute.xlu0 %314 }
 0x20f   :  { %v317_v33 = vadd.f32 %v315_v26, %v309_v29 }
 0x210   :  { %v252_v32 = vpop.permute.xlu1 %251 }
 0x211   :  { %v254_v34 = vadd.f32 %v252_v32, %v245_v30  ;;  %v324_v42 = vadd.f32 %v322_v38, %v317_v33 }
 0x213   :  { %v258_v37 = vadd.f32 %v257_v35, %v254_v34 }
 0x215   :  { %v266_v43 = vadd.f32 %v264_v39, %v258_v37 }
 0x216   :  { %v331_v45 = vpop.permute.xlu0 %330 }
 0x217   :  { %v333_v46 = vadd.f32 %v331_v45, %v324_v42  ;;  %v273_v49 = vadd.f32 %v271_v44, %v266_v43 }
 0x218   :  { %v343_v51 = vpop.permute.xlu1 %342 }
 0x219   :  { %v337_v50 = vadd.f32 %v336_v48, %v333_v46 }
 0x21b   :  { %v345_v53 = vadd.f32 %v343_v51, %v337_v50 }
 0x21d   :  { %v352_v54 = vadd.f32 %v350_v52, %v345_v53 }
 0x21e   :  { %v280_v58 = vpop.permute.xlu0 %279 }
 0x21f   :  { %v361_v59 = vadd.f32 %v359_v55, %v352_v54  ;;  %v282_v60 = vadd.f32 %v280_v58, %v273_v49 }
 0x221   :  { %v364_v61 = vadd.f32 %v363_v56, %v361_v59  ;;  %v285_v62 = vadd.f32 %v284_v57, %v282_v60 }
 0x223   :  { %v424_v1 = vmul.f32 -1.442695, %v364_v61  ;;  %v414_v2 = vmul.f32 -1.442695, %v285_v62 }
 0x225   :  { %443 = vpow2.f32 %v424_v1 }
 0x226   :  { %445 = vpow2.f32 %v414_v2 }
 0x22b   :  { %v444_v3 = vpop.eup %443 }
 0x22c   :  { %v446_v4 = vpop.eup %445  ;;  %v368_v63 = vadd.f32 1.0, %v444_v3 }
 0x22d   :  { %v289_v0 = vadd.f32 1.0, %v446_v4 }
 0x22e   :  { %447 = vrcp.f32 %v368_v63  ;;  %v380_v11 = vand.u32 2147483648, %v368_v63  ;;  %v378_v13 = vand.u32 2147483647, %v368_v63  ;;  %vm374_vm9 = vweird.f32 %v368_v63 }
 0x22f   :  { %449 = vrcp.f32 %v289_v0  ;;  %v301_v14 = vand.u32 2147483648, %v289_v0  ;;  %v299_v16 = vand.u32 2147483647, %v289_v0  ;;  %vm295_vm12 = vweird.f32 %v289_v0 }
 0x230   :  { %v381_v18 = vor.u32 1.1754944e-38, %v380_v11  ;;  %vm379_vm13 = vcmp.eq.f32.partialorder %v378_v13, 8.507059e+37 }
 0x231   :  { %v302_v21 = vor.u32 1.1754944e-38, %v301_v14  ;;  %vm300_vm15 = vcmp.eq.f32.partialorder %v299_v16, 8.507059e+37 }
 0x234   :  { %v448_v6 = vpop.eup %447 }
 0x235   :  { %v450_v7 = vpop.eup %449  ;;  %v370_v8 = vmul.f32 %v448_v6, %v368_v63  ;;  %vm375_vm7 = vweird.f32 %v448_v6 }
 0x236   :  { %v291_v9 = vmul.f32 %v450_v7, %v289_v0  ;;  %vm296_vm8 = vweird.f32 %v450_v7  ;;  %vm376_vm10 = vmor %vm374_vm9, %vm375_vm7 }
 0x237   :  { %v371_v10 = vsub.f32 1.0, %v370_v8  ;;  %vm297_vm14 = vmor %vm295_vm12, %vm296_vm8 }
 0x238   :  { %v292_v12 = vsub.f32 1.0, %v291_v9 }
 0x239   :  { %v372_v5 = vmul.f32 %v448_v6, %v371_v10 }
 0x23a   :  { %v293_v15 = vmul.f32 %v450_v7, %v292_v12 }
 0x23b   :  { %v373_v17 = vadd.f32 %v448_v6, %v372_v5 }
 0x23c   :  { %v294_v19 = vadd.f32 %v450_v7, %v293_v15 }
 0x23d   :  { %v377_v20 = vsel %vm376_vm10, %v448_v6, %v373_v17 }
 0x23e   :  { %v298_v22 = vsel %vm297_vm14, %v450_v7, %v294_v19  ;;  %v382_v23 = vsel %vm379_vm13, %v381_v18, %v377_v20 }
 0x23f   :  { %v303_v24 = vsel %vm300_vm15, %v302_v21, %v298_v22  ;;  %384 = vst.msk [vmem:[%s552_s2 + $0x2] sm:$0x3] %vm305_vm11, %v382_v23 }
 0x240   :  { %306 = vst.msk [vmem:[%s552_s2] sm:$0x3] %vm305_vm11, %v303_v24 }
 0x241   :  { %389 = vsyncpa [#allocation3], 1 }

</bundles_post_ra>
